<compile_context>
chip_gen: v7x
topology: tpu7x:2x2x1
jax: 0.10.0
libtpu: 0.0.40
codegen_flags: <defaults>
</compile_context>

<pallas_src>
import functools

import numpy as np
import jax
import jax.numpy as jnp
from jax.experimental import pallas as pl
from jax.experimental.pallas import tpu as pltpu


# ---------------------------------------------------------------------------
# Init-time parameter construction (numpy, runs ONCE per weight set).
# ---------------------------------------------------------------------------
def build_empty_model_params(conv_weight, data_mean, data_std, canvas_hw):
    """Returns (m_t_scaled [n_chan*n_pos, H*W], shift [n_chan*n_pos, 1], n_chan).

    Row (p*n_chan + c) of m_t_scaled dotted with the flattened canvas gives the
    normalized conv output for channel c at spatial position p (PyTorch Conv2d
    cross-correlation, valid padding), i.e. the (x-mean)/std is folded in:
      ((x-mean)/std) . row == x . (row/std) + (-mean/std) * sum(row)
    """
    H, W = canvas_hw
    w = np.asarray(conv_weight, dtype=np.float32)          # [Cout, 1, KH, KW]
    c_out, c_in, KH, KW = w.shape
    assert c_in == 1
    OH, OW = H - KH + 1, W - KW + 1
    n_pos = OH * OW

    rows = np.zeros((n_pos * c_out, H * W), dtype=np.float32)
    for oi in range(OH):
        for oj in range(OW):
            p = oi * OW + oj
            for c in range(c_out):
                canvas = np.zeros((H, W), dtype=np.float32)
                canvas[oi:oi + KH, oj:oj + KW] = w[c, 0]
                rows[p * c_out + c] = canvas.reshape(-1)    # position-major rows

    # NOTE: this fold is exact only for SCALAR data_mean / data_std.
    m_t_scaled = rows / float(data_std)
    shift = (-float(data_mean) / float(data_std)) * rows.sum(axis=1, keepdims=True)
    return jnp.asarray(m_t_scaled), jnp.asarray(shift), c_out


# ---------------------------------------------------------------------------
# Kernel
# ---------------------------------------------------------------------------
def empty_model_kernel(xt_ref, m_ref, shift_ref, o_ref, *, n_chan, n_pos):
    # xt_ref:    [H*W, B_block]          batch on the lane axis
    # m_ref:     [n_chan*n_pos, H*W]     grid-invariant (VMEM-resident)
    # shift_ref: [n_chan*n_pos, 1]       grid-invariant
    # o_ref:     [n_chan, B_block]
    y = jnp.dot(m_ref[...], xt_ref[...],
                preferred_element_type=jnp.float32) + shift_ref[...]

    # max_pool2d((2,2)) over the full conv output == max over the n_pos
    # positions of each channel. Rows are position-major, so each contiguous
    # [n_chan, B] sublane slice is channel-aligned -> pairwise maximum tree.
    parts = [y[p * n_chan:(p + 1) * n_chan, :] for p in range(n_pos)]
    while len(parts) > 1:
        nxt = [jnp.maximum(parts[i], parts[i + 1])
               for i in range(0, len(parts) - 1, 2)]
        if len(parts) % 2:
            nxt.append(parts[-1])
        parts = nxt
    o_ref[...] = parts[0].astype(o_ref.dtype)


# ---------------------------------------------------------------------------
# Forward wrapper
# ---------------------------------------------------------------------------
def empty_model_forward(x, m_t_scaled, shift, n_chan, *, block_b=2048):
    """x: [B, 1, H, W] f32. Returns [B, n_chan] (== cat([L, T], dim=1))."""
    B, c_in, H, W = x.shape
    assert c_in == 1
    ncols, hw = m_t_scaled.shape
    assert hw == H * W
    n_pos = ncols // n_chan

    # Batch onto the lane axis: [H*W, B]
    x_t = x.reshape(B, H * W).T.astype(jnp.float32)

    if B <= block_b:
        bb, pad = B, 0                      # single full-extent block
    else:
        bb = block_b                        # multiple of 128 -> valid lane block
        pad = (-B) % bb
        if pad:
            x_t = jnp.pad(x_t, ((0, 0), (0, pad)))
    Bp = B + pad
    grid = (Bp // bb,)

    kernel = functools.partial(empty_model_kernel, n_chan=n_chan, n_pos=n_pos)
    out_t = pl.pallas_call(
        kernel,
        out_shape=jax.ShapeDtypeStruct((n_chan, Bp), jnp.float32),
        grid=grid,
        in_specs=[
            pl.BlockSpec((hw, bb), lambda i: (0, i)),       # x_T: stream over B
            pl.BlockSpec((ncols, hw), lambda i: (0, 0)),    # M:   grid-invariant
            pl.BlockSpec((ncols, 1), lambda i: (0, 0)),     # shift
        ],
        out_specs=pl.BlockSpec((n_chan, bb), lambda i: (0, i)),
        compiler_params=pltpu.CompilerParams(
            dimension_semantics=("parallel",)),             # megacore on v7x
    )(x_t, m_t_scaled, shift)

    return out_t[:, :B].T                                   # [B, n_chan]


# ---------------------------------------------------------------------------
# Pure-JAX reference
# ---------------------------------------------------------------------------
def empty_model_reference(x, conv_weight, data_mean, data_std):
    xn = (x - data_mean) / data_std
    y = jax.lax.conv_general_dilated(
        xn, conv_weight, window_strides=(1, 1), padding="VALID",
        dimension_numbers=("NCHW", "OIHW", "NCHW"),
    )                                        # [B, 2, OH, OW]
    return jnp.max(y, axis=(2, 3))           # max_pool2d((2,2)) + cat == per-ch max


if __name__ == "__main__":
    # Shapes implied by the module: 3x3 pattern, 4x4 canvas, 2 conv channels.
    B, PATTERN, CANVAS = 8, 3, 4
    DATA_MEAN, DATA_STD = 0.5, 0.25

    key = jax.random.PRNGKey(0)
    kx, kw = jax.random.split(key)
    x = jax.random.normal(kx, (B, 1, CANVAS, CANVAS), dtype=jnp.float32)
    # nn.Conv2d default init bound: 1/sqrt(fan_in) = 1/sqrt(1*3*3)
    lim = 1.0 / (PATTERN * PATTERN) ** 0.5
    w = jax.random.uniform(kw, (2, 1, PATTERN, PATTERN), jnp.float32, -lim, lim)

    # Init-time (hoisted out of the per-call path).
    m_t, shift, n_chan = build_empty_model_params(
        w, DATA_MEAN, DATA_STD, (CANVAS, CANVAS))

    out = empty_model_forward(x, m_t, shift, n_chan)
    out = jax.block_until_ready(out)

    ref = empty_model_reference(x, w, DATA_MEAN, DATA_STD)
    assert out.shape == (B, 2)
    assert jnp.allclose(out, ref, atol=1e-5, rtol=1e-5)

    # TODO(synk): `predict()`'s max_pool return_indices (flattened row-major
    # argmax) is an inference-only method, not part of forward(); not implemented.

    print("KERNEL_OK")
</pallas_src>

<mosaic_0001>
module attributes {stable_mosaic.version = 11 : i64} {
  func.func @empty_model_kernel(%arg0: i32, %arg1: memref<16x8xf32, #tpu.memory_space<vmem>>, %arg2: memref<8x16xf32, #tpu.memory_space<vmem>>, %arg3: memref<8x1xf32, #tpu.memory_space<vmem>>, %arg4: memref<2x8xf32, #tpu.memory_space<vmem>>) attributes {dimension_semantics = [#tpu.dimension_semantics<parallel>], iteration_bounds = array<i64: 1>, scalar_prefetch = 0 : i64, scratch_operands = 0 : i64, tpu.core_type = #tpu.core_type<tc>, window_params = [{transform_indices = @transform_0, window_bounds = array<i64: 16, 8>}, {pipeline_mode = #tpu.pipeline_mode<synchronous>, transform_indices = @transform_1, window_bounds = array<i64: 8, 16>}, {pipeline_mode = #tpu.pipeline_mode<synchronous>, transform_indices = @transform_2, window_bounds = array<i64: 8, 1>}, {transform_indices = @transform_3, window_bounds = array<i64: 2, 8>}]} {
    %c0 = arith.constant 0 : index
    %c0_0 = arith.constant 0 : index
    %0 = vector.load %arg2[%c0, %c0_0] : memref<8x16xf32, #tpu.memory_space<vmem>>, vector<8x16xf32>
    %c0_1 = arith.constant 0 : index
    %c0_2 = arith.constant 0 : index
    %1 = vector.load %arg1[%c0_1, %c0_2] : memref<16x8xf32, #tpu.memory_space<vmem>>, vector<16x8xf32>
    %cst = arith.constant dense<0.000000e+00> : vector<8x8xf32>
    %2 = tpu.matmul %0, %1, %cst {dimension_numbers = #tpu.dot_dimension_numbers<[1], [0], [0], [1], [0, 0, 1, 1], [], []>} : vector<8x16xf32>, vector<16x8xf32>, vector<8x8xf32> -> vector<8x8xf32>
    %c0_3 = arith.constant 0 : index
    %c0_4 = arith.constant 0 : index
    %3 = vector.load %arg3[%c0_3, %c0_4] : memref<8x1xf32, #tpu.memory_space<vmem>>, vector<8x1xf32>
    %4 = vector.broadcast %3 : vector<8x1xf32> to vector<8x8xf32>
    %5 = arith.addf %2, %4 : vector<8x8xf32>
    %6 = vector.extract_strided_slice %5 {offsets = [0, 0], sizes = [2, 8], strides = [1, 1]} : vector<8x8xf32> to vector<2x8xf32>
    %7 = vector.extract_strided_slice %5 {offsets = [2, 0], sizes = [2, 8], strides = [1, 1]} : vector<8x8xf32> to vector<2x8xf32>
    %8 = vector.extract_strided_slice %5 {offsets = [4, 0], sizes = [2, 8], strides = [1, 1]} : vector<8x8xf32> to vector<2x8xf32>
    %9 = vector.extract_strided_slice %5 {offsets = [6, 0], sizes = [2, 8], strides = [1, 1]} : vector<8x8xf32> to vector<2x8xf32>
    %10 = arith.maximumf %6, %7 : vector<2x8xf32>
    %11 = arith.maximumf %8, %9 : vector<2x8xf32>
    %12 = arith.maximumf %10, %11 : vector<2x8xf32>
    %c0_5 = arith.constant 0 : index
    %c0_6 = arith.constant 0 : index
    %13 = vector.load %arg4[%c0_5, %c0_6] : memref<2x8xf32, #tpu.memory_space<vmem>>, vector<2x8xf32>
    tpu.vector_store %arg4[%c0_5, %c0_6], %12 {strides = array<i32>} : memref<2x8xf32, #tpu.memory_space<vmem>>, vector<2x8xf32>,
    return
  }
  func.func @transform_0(%arg0: i32) -> (i32, i32) {
    %c0_i32 = arith.constant 0 : i32
    %c0_i32_0 = arith.constant 0 : i32
    return %c0_i32, %arg0 : i32, i32
  }
  func.func @transform_1(%arg0: i32) -> (i32, i32) {
    %c0_i32 = arith.constant 0 : i32
    %c0_i32_0 = arith.constant 0 : i32
    %c0_i32_1 = arith.constant 0 : i32
    return %c0_i32, %c0_i32_0 : i32, i32
  }
  func.func @transform_2(%arg0: i32) -> (i32, i32) {
    %c0_i32 = arith.constant 0 : i32
    %c0_i32_0 = arith.constant 0 : i32
    %c0_i32_1 = arith.constant 0 : i32
    return %c0_i32, %c0_i32_0 : i32, i32
  }
  func.func @transform_3(%arg0: i32) -> (i32, i32) {
    %c0_i32 = arith.constant 0 : i32
    %c0_i32_0 = arith.constant 0 : i32
    return %c0_i32, %arg0 : i32, i32
  }
}

</mosaic_0001>

<bundles_post_ra>
// kernel: tpu_custom_call.1
= control target key start
LH: loop header
LB: loop body
LE: loop exit
PB: predicated region body
PF: predicated region fallthrough
CT: control target
= control target key end

     0   :  { %v166_v2 = vmov 0.0|0.0   ;;  %vm167_vm0 = vmmov 0   ;;  %v168_v4 = vmov 0.0   ;;  %s215_s0 = inlined_call_operand.vmem [shape: f32[16,8], index: 0, kind: input, shape index: {}]   ;;  %s216_s1 = inlined_call_operand.vmem [shape: f32[8,16], index: 1, kind: input, shape index: {}]   ;;  %s217_s2 = inlined_call_operand.vmem [shape: f32[8,1], index: 2, kind: input, shape index: {}]   ;;  %s218_s3 = inlined_call_operand.hbm [shape: f32[2,8], index: 3, kind: output, shape index: {}]  }
   0x1   :  { %v16_v0 = vld [vmem:[%s215_s0] sm:$0xff]  ;;  %v17_v1 = vld [vmem:[%s215_s0 + $0x8] sm:$0xff]  ;;  %133 = vmatprep.subr.bf16.mxu0 %v166_v2  ;;  %130 = vmatprep.mubr.msk.f32.mxu0 %vm167_vm0, %v168_v4 }
   0x2   :  { %v134_v3 = vpack.c.bf16 %v17_v1, %v16_v0  ;;  %v18_v5 = vld [vmem:[%s217_s2] sm:$0xff] }
   0x3   :  { %8 = vsyncpa [#allocation3], 0  ;;  %v169_v6 = vmov 0   ;;  %v15_v7 = vld [vmem:[%s216_s1] sm:$0xff]  ;;  %vm24_vm1 = vcmask 130048   ;;  %s170_s0 = smov [#allocation2]  }
   0x4   :  { %141 = vset.pattern.permute.xlu0 %v169_v6  ;;  %135 = vmatpush3.bf16.msra.mxu0 %v134_v3  ;;  %s114_s20 = sshll.u32 %s170_s0, 4  ;;  %vm106_vm2 = vcmask 58368   ;;  %s115_s20 = int_to_ptr.vmem [resolvable:$true] %s114_s20 }
   0x5   :  { %21 = vperm.xlu0 %141, %v18_v5   ;;  %s142_s2 = scalar_lea.vmem %s115_s20, 32  ;;  %p147_p1 = scmp.lt.s32.totalorder %s115_s20, %s115_s20 }
   0x6   :  { %p143_p0 = scmp.ne.s32.totalorder %s115_s20, %s142_s2  ;;  %p148_p2 = scmp.lt.s32.totalorder %s142_s2, %s142_s2 }
   0x7   :  { %131 = vmatmul.mubr.msk.f32.vlgmr.msra.gmra.mrb[0].mxu0 %vm24_vm1, %v15_v7 }
   0x8   :  { %p149_p3 = por %p148_p2, %p147_p1 }
   0xa   :  { %p150_p4 = pnand %p149_p3, %p143_p0 }
  0x84   :  { %v22_v8 = vpop.permute.xlu0 %21 }
  0xda   :  { %v94_v9 = vpop.f32.mrb[0].mxu0 }
  0xdb   :  { %v95_v10 = vadd.f32 %v94_v9, %v22_v8  ;;  %v132_v11 = vpop.f32.mrb[1].mxu0 }
  0xdd   :  { %v99_v12 = vrot.slane %v95_v10, 2 }
  0xdf   :  { %v101_v13 = vmax.f32 %v95_v10, %v99_v12 }
  0xe1   :  { %v103_v14 = vrot.slane %v101_v13, 4 }
  0xe3   :  { %v105_v15 = vmax.f32 %v101_v13, %v103_v14 }
  0xe5   :  { %107 = vst.msk [vmem:[#allocation2] sm:$0x3] %vm106_vm2, %v105_v15 }
  0xe6   :  { %153 = shalt.err (!%p150_p4)
}
  0xe7   :  { %s154_s22 = scalar_lea.hbm %s218_s3, 32 }
  0xe8   :  { %p155_p5 = scmp.ne.s32.totalorder %s218_s3, %s154_s22  ;;  %p158_p6 = scmp.lt.u32.totalorder %s154_s22, %s218_s3 }
  0xea   :  { %p160_p7 = pnand %p158_p6, %p155_p5 }
  0xec   :  { %163 = shalt.err (!%p160_p7)
}
  0xed   :  { %117 = dma.vmem_to_hbm [thread:$0]  %s115_s20, 32, %s218_s3, [#allocation3]  }
  0xee   :  { %164 = dma.done.wait [#allocation3], 32  }
  0xef   :  { %165 = vsyncadd [#allocation3], 4294967264 }
  0xf0   :  { %121 = vsyncpa [#allocation3], 1 }

</bundles_post_ra>
